<compile_context>
chip_gen: v7x
topology: tpu7x:2x2x1
jax: 0.10.0
libtpu: 0.0.40
codegen_flags: <defaults>
</compile_context>

<pallas_src>
import functools

import jax
import jax.numpy as jnp
from jax.experimental import pallas as pl
from jax.experimental.pallas import tpu as pltpu

LOG_STD_MIN = -20.0
LOG_STD_MAX = 2.0
LEAKY_SLOPE = 0.01  # F.leaky_relu default negative_slope


def _cdiv(a, b):
    return -(-a // b)


def _round_up(n, m):
    return _cdiv(n, m) * m


def _policy_kernel(x_ref, w1_ref, b1_ref, w2_ref, b2_ref, wh_ref, bh_ref,
                   out_ref, *, action_dim):
    # fc_1 + leaky_relu. Padded input columns / hidden columns are exact zeros
    # (zero weights + zero bias, leaky_relu(0)=0), so padding never leaks.
    x = x_ref[...].astype(jnp.bfloat16)
    h = jnp.dot(x, w1_ref[...], preferred_element_type=jnp.float32) + b1_ref[...]
    h = jnp.maximum(h, LEAKY_SLOPE * h)

    # fc_2 + leaky_relu
    h = jnp.dot(h.astype(jnp.bfloat16), w2_ref[...],
                preferred_element_type=jnp.float32) + b2_ref[...]
    h = jnp.maximum(h, LEAKY_SLOPE * h)

    # fused mu|log_std head: width is exactly 2*action_dim (no lane padding),
    # so the HBM writeback only carries real data.
    head = jnp.dot(h.astype(jnp.bfloat16), wh_ref[...],
                   preferred_element_type=jnp.float32) + bh_ref[...]

    # clamp only the log_std lanes [action_dim, 2*action_dim); mu lanes untouched.
    lane = jax.lax.broadcasted_iota(jnp.int32, head.shape, 1)
    head = jnp.where(lane >= action_dim,
                     jnp.clip(head, LOG_STD_MIN, LOG_STD_MAX), head)

    out_ref[...] = head.astype(out_ref.dtype)


def pack_params(p, state_dim, action_dim, hidden=64):
    """One-time host-side packing: fuse mu|std heads, zero-pad to MXU-friendly
    shapes, and store matmul weights as bf16 (biases stay f32 and are added to
    the f32 accumulator). Padding is exact zeros, so math is unchanged."""
    SP = _round_up(state_dim, 8)       # padded state dim (3 -> 8)
    H = _round_up(hidden, 128)         # padded hidden dim (64 -> 128)
    HO = 2 * action_dim                # fused head width: exactly mu|log_std

    w1 = jnp.zeros((SP, H), jnp.float32).at[:state_dim, :hidden].set(p["w1"])
    b1 = jnp.zeros((1, H), jnp.float32).at[:, :hidden].set(p["b1"])
    w2 = jnp.zeros((H, H), jnp.float32).at[:hidden, :hidden].set(p["w2"])
    b2 = jnp.zeros((1, H), jnp.float32).at[:, :hidden].set(p["b2"])

    wh = jnp.zeros((H, HO), jnp.float32)
    wh = wh.at[:hidden, :action_dim].set(p["wmu"])
    wh = wh.at[:hidden, action_dim:].set(p["wstd"])
    bh = jnp.concatenate([p["bmu"], p["bstd"]], axis=1)   # (1, 2*A) f32

    return dict(w1=w1.astype(jnp.bfloat16), b1=b1,
                w2=w2.astype(jnp.bfloat16), b2=b2,
                wh=wh.astype(jnp.bfloat16), bh=bh,
                state_dim=state_dim, action_dim=action_dim,
                sp=SP, h=H, ho=HO)


def _batch_tiling(batch):
    """Pick (tile_rows, padded_batch_rows).

    - batch <= 16: single grid step (latency path, no point splitting).
    - otherwise: >= 2 grid steps so both v7x TensorCores get work, tiles capped
      at 2048 rows, tile size chosen per-batch to bound padding waste.
    """
    if batch <= 16:
        tb = _round_up(max(batch, 1), 8)
        return tb, tb
    n_steps = max(2, _cdiv(batch, 2048))
    tb = _round_up(_cdiv(batch, n_steps), 8)
    return tb, _round_up(batch, tb)


def policy_forward(x, packed):
    """PolicyNetwork.forward as one Pallas kernel.

    x: [batch, state_dim] float32
    packed: output of pack_params.
    Returns (mu [batch, action_dim], log_std [batch, action_dim]).
    """
    batch = x.shape[0]
    S, A = packed["state_dim"], packed["action_dim"]
    SP, H, HO = packed["sp"], packed["h"], packed["ho"]

    TB, BP = _batch_tiling(batch)
    grid = (BP // TB,)

    x = x.astype(jnp.float32)
    if BP != batch or SP != S:
        # Only pad when needed; under jit this fuses with the surrounding graph.
        x = jnp.pad(x, ((0, BP - batch), (0, SP - S)))

    resident = lambda i: (0, 0)  # weights/biases DMA'd once, stay in VMEM

    out = pl.pallas_call(
        functools.partial(_policy_kernel, action_dim=A),
        out_shape=jax.ShapeDtypeStruct((BP, HO), jnp.float32),
        grid=grid,
        in_specs=[
            pl.BlockSpec((TB, SP), lambda i: (i, 0)),   # x tile (streamed)
            pl.BlockSpec((SP, H), resident),            # w1 (bf16)
            pl.BlockSpec((1, H), resident),             # b1 (f32)
            pl.BlockSpec((H, H), resident),             # w2 (bf16)
            pl.BlockSpec((1, H), resident),             # b2 (f32)
            pl.BlockSpec((H, HO), resident),            # fused head weight (bf16)
            pl.BlockSpec((1, HO), resident),            # fused head bias (f32)
        ],
        out_specs=pl.BlockSpec((TB, HO), lambda i: (i, 0)),
        compiler_params=pltpu.CompilerParams(
            dimension_semantics=("parallel",)),
    )(x, packed["w1"], packed["b1"], packed["w2"], packed["b2"],
      packed["wh"], packed["bh"])

    mu = out[:batch, :A]
    log_std = out[:batch, A:]
    return mu, log_std


def init_params(key, state_dim, action_dim, hidden=64):
    """Deterministic parameter init mimicking nn.Linear's U(-1/sqrt(fan_in), .)."""
    def linear(k, fan_in, fan_out):
        kw, kb = jax.random.split(k)
        bound = 1.0 / jnp.sqrt(jnp.float32(fan_in))
        # stored as [in, out] (transposed w.r.t. PyTorch's [out, in])
        w = jax.random.uniform(kw, (fan_in, fan_out), jnp.float32, -bound, bound)
        b = jax.random.uniform(kb, (1, fan_out), jnp.float32, -bound, bound)
        return w, b

    k1, k2, k3, k4 = jax.random.split(key, 4)
    w1, b1 = linear(k1, state_dim, hidden)
    w2, b2 = linear(k2, hidden, hidden)
    wmu, bmu = linear(k3, hidden, action_dim)
    wstd, bstd = linear(k4, hidden, action_dim)
    return dict(w1=w1, b1=b1, w2=w2, b2=b2,
                wmu=wmu, bmu=bmu, wstd=wstd, bstd=bstd)


def policy_forward_ref(x, p, matmul_dtype=jnp.float32):
    """Pure-JAX reference (unpadded). matmul_dtype=bf16 mirrors the kernel's
    mixed-precision matmuls for a tight correctness check."""
    def mm(a, w):
        return jnp.dot(a.astype(matmul_dtype), w.astype(matmul_dtype),
                       preferred_element_type=jnp.float32)
    h = mm(x, p["w1"]) + p["b1"]
    h = jnp.where(h >= 0, h, LEAKY_SLOPE * h)
    h = mm(h, p["w2"]) + p["b2"]
    h = jnp.where(h >= 0, h, LEAKY_SLOPE * h)
    mu = mm(h, p["wmu"]) + p["bmu"]
    ls = jnp.clip(mm(h, p["wstd"]) + p["bstd"], LOG_STD_MIN, LOG_STD_MAX)
    return mu, ls


if __name__ == "__main__":
    # Pendulum-v1: state_dim=3, action_dim=1; small batch.
    state_dim, action_dim, batch = 3, 1, 8

    key = jax.random.PRNGKey(0)
    kp, kx = jax.random.split(key)
    params = init_params(kp, state_dim, action_dim)
    packed = pack_params(params, state_dim, action_dim)
    x = jax.random.normal(kx, (batch, state_dim), jnp.float32)

    # jit the wrapper so the (tiny) pad and the mu/log_std slices fuse around
    # the kernel into a single dispatch.
    fwd = jax.jit(lambda xx: policy_forward(xx, packed))
    mu, log_std = fwd(x)
    jax.block_until_ready((mu, log_std))

    assert mu.shape == (batch, action_dim) and log_std.shape == (batch, action_dim)

    # Tight check against a bf16-matmul reference (same mixed precision).
    mu_bf, ls_bf = policy_forward_ref(x, params, matmul_dtype=jnp.bfloat16)
    assert jnp.allclose(mu, mu_bf, atol=5e-3, rtol=5e-3)
    assert jnp.allclose(log_std, ls_bf, atol=5e-3, rtol=5e-3)

    # Semantic check against the full-f32 reference (bf16-level tolerance).
    mu_f32, ls_f32 = policy_forward_ref(x, params, matmul_dtype=jnp.float32)
    assert jnp.allclose(mu, mu_f32, atol=5e-2, rtol=5e-2)
    assert jnp.allclose(log_std, ls_f32, atol=5e-2, rtol=5e-2)

    print("KERNEL_OK")
</pallas_src>

<mosaic_0001>
module attributes {stable_mosaic.version = 11 : i64} {
  func.func @_policy_kernel(%arg0: i32, %arg1: memref<8x8xf32, #tpu.memory_space<vmem>>, %arg2: memref<8x128xbf16, #tpu.memory_space<vmem>>, %arg3: memref<1x128xf32, #tpu.memory_space<vmem>>, %arg4: memref<128x128xbf16, #tpu.memory_space<vmem>>, %arg5: memref<1x128xf32, #tpu.memory_space<vmem>>, %arg6: memref<128x2xbf16, #tpu.memory_space<vmem>>, %arg7: memref<1x2xf32, #tpu.memory_space<vmem>>, %arg8: memref<8x2xf32, #tpu.memory_space<vmem>>) attributes {dimension_semantics = [#tpu.dimension_semantics<parallel>], iteration_bounds = array<i64: 1>, scalar_prefetch = 0 : i64, scratch_operands = 0 : i64, tpu.core_type = #tpu.core_type<tc>, window_params = [{transform_indices = @transform_0, window_bounds = array<i64: 8, 8>}, {pipeline_mode = #tpu.pipeline_mode<synchronous>, transform_indices = @transform_1, window_bounds = array<i64: 8, 128>}, {pipeline_mode = #tpu.pipeline_mode<synchronous>, transform_indices = @transform_2, window_bounds = array<i64: 1, 128>}, {pipeline_mode = #tpu.pipeline_mode<synchronous>, transform_indices = @transform_3, window_bounds = array<i64: 128, 128>}, {pipeline_mode = #tpu.pipeline_mode<synchronous>, transform_indices = @transform_4, window_bounds = array<i64: 1, 128>}, {pipeline_mode = #tpu.pipeline_mode<synchronous>, transform_indices = @transform_5, window_bounds = array<i64: 128, 2>}, {pipeline_mode = #tpu.pipeline_mode<synchronous>, transform_indices = @transform_6, window_bounds = array<i64: 1, 2>}, {transform_indices = @transform_7, window_bounds = array<i64: 8, 2>}]} {
    %c0 = arith.constant 0 : index
    %c0_0 = arith.constant 0 : index
    %0 = vector.load %arg1[%c0, %c0_0] : memref<8x8xf32, #tpu.memory_space<vmem>>, vector<8x8xf32>
    %1 = arith.truncf %0 : vector<8x8xf32> to vector<8x8xbf16>
    %c0_1 = arith.constant 0 : index
    %c0_2 = arith.constant 0 : index
    %2 = vector.load %arg2[%c0_1, %c0_2] : memref<8x128xbf16, #tpu.memory_space<vmem>>, vector<8x128xbf16>
    %cst = arith.constant dense<0.000000e+00> : vector<8x128xf32>
    %3 = tpu.matmul %1, %2, %cst {dimension_numbers = #tpu.dot_dimension_numbers<[1], [0], [0], [1], [0, 0, 1, 1], [], []>} : vector<8x8xbf16>, vector<8x128xbf16>, vector<8x128xf32> -> vector<8x128xf32>
    %c0_3 = arith.constant 0 : index
    %c0_4 = arith.constant 0 : index
    %4 = vector.load %arg3[%c0_3, %c0_4] : memref<1x128xf32, #tpu.memory_space<vmem>>, vector<1x128xf32>
    %5 = vector.broadcast %4 : vector<1x128xf32> to vector<8x128xf32>
    %6 = arith.addf %3, %5 : vector<8x128xf32>
    %cst_5 = arith.constant 0.00999999977 : f32
    %7 = vector.broadcast %cst_5 : f32 to vector<8x128xf32>
    %8 = arith.mulf %7, %6 : vector<8x128xf32>
    %9 = arith.maximumf %6, %8 : vector<8x128xf32>
    %10 = arith.truncf %9 : vector<8x128xf32> to vector<8x128xbf16>
    %c0_6 = arith.constant 0 : index
    %c0_7 = arith.constant 0 : index
    %11 = vector.load %arg4[%c0_6, %c0_7] : memref<128x128xbf16, #tpu.memory_space<vmem>>, vector<128x128xbf16>
    %cst_8 = arith.constant dense<0.000000e+00> : vector<8x128xf32>
    %12 = tpu.matmul %10, %11, %cst_8 {dimension_numbers = #tpu.dot_dimension_numbers<[1], [0], [0], [1], [0, 0, 1, 1], [], []>} : vector<8x128xbf16>, vector<128x128xbf16>, vector<8x128xf32> -> vector<8x128xf32>
    %c0_9 = arith.constant 0 : index
    %c0_10 = arith.constant 0 : index
    %13 = vector.load %arg5[%c0_9, %c0_10] : memref<1x128xf32, #tpu.memory_space<vmem>>, vector<1x128xf32>
    %14 = vector.broadcast %13 : vector<1x128xf32> to vector<8x128xf32>
    %15 = arith.addf %12, %14 : vector<8x128xf32>
    %cst_11 = arith.constant 0.00999999977 : f32
    %16 = vector.broadcast %cst_11 : f32 to vector<8x128xf32>
    %17 = arith.mulf %16, %15 : vector<8x128xf32>
    %18 = arith.maximumf %15, %17 : vector<8x128xf32>
    %19 = arith.truncf %18 : vector<8x128xf32> to vector<8x128xbf16>
    %c0_12 = arith.constant 0 : index
    %c0_13 = arith.constant 0 : index
    %20 = vector.load %arg6[%c0_12, %c0_13] : memref<128x2xbf16, #tpu.memory_space<vmem>>, vector<128x2xbf16>
    %cst_14 = arith.constant dense<0.000000e+00> : vector<8x2xf32>
    %21 = tpu.matmul %19, %20, %cst_14 {dimension_numbers = #tpu.dot_dimension_numbers<[1], [0], [0], [1], [0, 0, 1, 1], [], []>} : vector<8x128xbf16>, vector<128x2xbf16>, vector<8x2xf32> -> vector<8x2xf32>
    %c0_15 = arith.constant 0 : index
    %c0_16 = arith.constant 0 : index
    %22 = vector.load %arg7[%c0_15, %c0_16] : memref<1x2xf32, #tpu.memory_space<vmem>>, vector<1x2xf32>
    %23 = vector.broadcast %22 : vector<1x2xf32> to vector<8x2xf32>
    %24 = arith.addf %21, %23 : vector<8x2xf32>
    %25 = tpu.iota {dimensions = array<i32: 1>} : vector<8x2xi32>
    %c1_i32 = arith.constant 1 : i32
    %26 = vector.broadcast %c1_i32 : i32 to vector<8x2xi32>
    %27 = arith.cmpi sge, %25, %26 : vector<8x2xi32>
    %cst_17 = arith.constant -2.000000e+01 : f32
    %cst_18 = arith.constant 2.000000e+00 : f32
    %28 = vector.broadcast %cst_17 : f32 to vector<8x2xf32>
    %29 = arith.maximumf %28, %24 : vector<8x2xf32>
    %30 = vector.broadcast %cst_18 : f32 to vector<8x2xf32>
    %31 = arith.minimumf %30, %29 : vector<8x2xf32>
    %32 = arith.select %27, %31, %24 : vector<8x2xi1>, vector<8x2xf32>
    %c0_19 = arith.constant 0 : index
    %c0_20 = arith.constant 0 : index
    %33 = vector.load %arg8[%c0_19, %c0_20] : memref<8x2xf32, #tpu.memory_space<vmem>>, vector<8x2xf32>
    tpu.vector_store %arg8[%c0_19, %c0_20], %32 {strides = array<i32>} : memref<8x2xf32, #tpu.memory_space<vmem>>, vector<8x2xf32>,
    return
  }
  func.func @transform_0(%arg0: i32) -> (i32, i32) {
    %c0_i32 = arith.constant 0 : i32
    %c0_i32_0 = arith.constant 0 : i32
    return %arg0, %c0_i32 : i32, i32
  }
  func.func @transform_1(%arg0: i32) -> (i32, i32) {
    %c0_i32 = arith.constant 0 : i32
    %c0_i32_0 = arith.constant 0 : i32
    %c0_i32_1 = arith.constant 0 : i32
    return %c0_i32, %c0_i32_0 : i32, i32
  }
  func.func @transform_2(%arg0: i32) -> (i32, i32) {
    %c0_i32 = arith.constant 0 : i32
    %c0_i32_0 = arith.constant 0 : i32
    %c0_i32_1 = arith.constant 0 : i32
    return %c0_i32, %c0_i32_0 : i32, i32
  }
  func.func @transform_3(%arg0: i32) -> (i32, i32) {
    %c0_i32 = arith.constant 0 : i32
    %c0_i32_0 = arith.constant 0 : i32
    %c0_i32_1 = arith.constant 0 : i32
    return %c0_i32, %c0_i32_0 : i32, i32
  }
  func.func @transform_4(%arg0: i32) -> (i32, i32) {
    %c0_i32 = arith.constant 0 : i32
    %c0_i32_0 = arith.constant 0 : i32
    %c0_i32_1 = arith.constant 0 : i32
    return %c0_i32, %c0_i32_0 : i32, i32
  }
  func.func @transform_5(%arg0: i32) -> (i32, i32) {
    %c0_i32 = arith.constant 0 : i32
    %c0_i32_0 = arith.constant 0 : i32
    %c0_i32_1 = arith.constant 0 : i32
    return %c0_i32, %c0_i32_0 : i32, i32
  }
  func.func @transform_6(%arg0: i32) -> (i32, i32) {
    %c0_i32 = arith.constant 0 : i32
    %c0_i32_0 = arith.constant 0 : i32
    %c0_i32_1 = arith.constant 0 : i32
    return %c0_i32, %c0_i32_0 : i32, i32
  }
  func.func @transform_7(%arg0: i32) -> (i32, i32) {
    %c0_i32 = arith.constant 0 : i32
    %c0_i32_0 = arith.constant 0 : i32
    return %arg0, %c0_i32 : i32, i32
  }
}

</mosaic_0001>

<bundles_post_ra>
// kernel: _lambda_.1
= control target key start
LH: loop header
LB: loop body
LE: loop exit
PB: predicated region body
PF: predicated region fallthrough
CT: control target
= control target key end

     0   :  { %12 = vsyncpa [#allocation3], 0  ;;  %s622_s0 = inlined_call_operand.vmem [shape: f32[8,8], index: 0, kind: input, shape index: {}]   ;;  %s623_s1 = inlined_call_operand.vmem [shape: bf16[8,128], index: 1, kind: input, shape index: {}]   ;;  %s624_s2 = inlined_call_operand.vmem [shape: f32[1,128], index: 2, kind: input, shape index: {}]   ;;  %s625_s3 = inlined_call_operand.hbm [shape: bf16[128,128], index: 3, kind: input, shape index: {}]   ;;  %s626_s4 = inlined_call_operand.vmem [shape: f32[1,128], index: 4, kind: input, shape index: {}]   ;;  %s627_s5 = inlined_call_operand.hbm [shape: bf16[128,2], index: 5, kind: input, shape index: {}]   ;;  %s628_s6 = inlined_call_operand.vmem [shape: f32[1,2], index: 6, kind: input, shape index: {}]   ;;  %s629_s7 = inlined_call_operand.vmem [shape: f32[8,2], index: 7, kind: output, shape index: {}]  }
   0x1   :  { %13 = vsyncpa [#allocation5], 0  ;;  %s511_s24 = smov [#allocation2]   ;;  %s463_s28 = scalar_lea.hbm %s625_s3, 1024 }
   0x2   :  { %s25_s25 = sshll.u32 %s511_s24, 4  ;;  %p464_p0 = scmp.ne.s32.totalorder %s625_s3, %s463_s28  ;;  %s26_s25 = int_to_ptr.vmem [resolvable:$true] %s25_s25 }
   0x3   :  { %p467_p1 = scmp.lt.u32.totalorder %s463_s28, %s625_s3 }
   0x5   :  { %p469_p2 = pnand %p467_p1, %p464_p0 }
   0x7   :  { %472 = shalt.err (!%p469_p2)
}
   0x8   :  { %s473_s10 = scalar_lea.vmem %s26_s25, 1024  ;;  %p478_p4 = scmp.lt.s32.totalorder %s26_s25, %s26_s25 }
   0x9   :  { %p474_p3 = scmp.ne.s32.totalorder %s26_s25, %s473_s10  ;;  %p479_p5 = scmp.lt.s32.totalorder %s473_s10, %s473_s10 }
   0xb   :  { %p480_p6 = por %p479_p5, %p478_p4 }
   0xd   :  { %p481_p7 = pnand %p480_p6, %p474_p3 }
   0xf   :  { %484 = shalt.err (!%p481_p7)
}
  0x10   :  { %s512_s11 = smov 64   ;;  %s513_s12 = smov 4  }
  0x11   :  { %31 = dma.hbm_to_vmem [thread:$0]  %s625_s3, 1024, %s26_s25, [#allocation3], %s512_s11, %s512_s11, %s513_s12  }
  0x12   :  { %s514_s15 = smov [#allocation4]   ;;  %s485_s19 = scalar_lea.hbm %s627_s5, 1024 }
  0x13   :  { %s39_s16 = sshll.u32 %s514_s15, 4  ;;  %p486_p8 = scmp.ne.s32.totalorder %s627_s5, %s485_s19  ;;  %s40_s16 = int_to_ptr.vmem [resolvable:$true] %s39_s16 }
  0x14   :  { %p489_p9 = scmp.lt.u32.totalorder %s485_s19, %s627_s5 }
  0x16   :  { %p491_p10 = pnand %p489_p9, %p486_p8 }
  0x18   :  { %494 = shalt.err (!%p491_p10)
}
  0x19   :  { %s495_s24 = scalar_lea.vmem %s40_s16, 1024  ;;  %p500_p12 = scmp.lt.s32.totalorder %s40_s16, %s40_s16 }
  0x1a   :  { %p496_p11 = scmp.ne.s32.totalorder %s40_s16, %s495_s24  ;;  %p501_p13 = scmp.lt.s32.totalorder %s495_s24, %s495_s24 }
  0x1c   :  { %p502_p0 = por %p501_p13, %p500_p12 }
  0x1e   :  { %p503_p1 = pnand %p502_p0, %p496_p11 }
  0x20   :  { %506 = shalt.err (!%p503_p1)
}
  0x21   :  { %45 = dma.hbm_to_vmem [thread:$0]  %s627_s5, 1024, %s40_s16, [#allocation5], %s512_s11, %s512_s11, %s513_s12  }
  0x22   :  { %507 = dma.done.wait [#allocation3], 1024  }
  0x23   :  { %508 = vsyncadd [#allocation3], 4294966272 }
  0x24   :  { %509 = dma.done.wait [#allocation5], 1024  }
  0x25   :  { %510 = vsyncadd [#allocation5], 4294966272  ;;  %v515_v0 = vmov 0.0   ;;  %vm516_vm0 = vmmov 0   ;;  %vm69_vm1 = vcmask 1043456   ;;  %v55_v2 = vld [vmem:[%s622_s0] sm:$0xff]  ;;  %v341_v39 = vlaneseq }
  0x26   :  { %395 = vmatprep.subr.bf16.mxu0 %v515_v0  ;;  %397 = vmatprep.mubr.msk.bf16.mxu0 %vm516_vm0, %v515_v0  ;;  %v57_v1 = vld [vmem:[%s623_s1] sm:$0xf]  ;;  %v56_v4 = vpack.c.bf16 %v55_v2, %v55_v2  ;;  %vm65_vm2 = vcmask 64512   ;;  %v448_v6 = vld [vmem:[#allocation2 + $0x8] sm:$0xff]   ;;  %v449_v7 = vld [vmem:[#allocation2 + $0x10] sm:$0xff]   ;;  %vm347_vm4 = vcmask 15360  }
  0x27   :  { %401 = vmatprep.subr.bf16.mxu1 %v515_v0  ;;  %417 = vmatprep.mubr.msk.bf16.mxu1 %vm516_vm0, %v515_v0  ;;  %v71_v3 = vsel %vm69_vm1, %v57_v1, 0  ;;  %v447_v5 = vld [vmem:[#allocation2] sm:$0xff]   ;;  %v450_v8 = vld [vmem:[#allocation2 + $0x18] sm:$0xff]   ;;  %v452_v10 = vld [vmem:[#allocation2 + $0x28] sm:$0xff]   ;;  %v342_v42 = vand.u32 127, %v341_v39 }
  0x28   :  { %396 = vmatpush3.bf16.msra.mxu0 %v71_v3  ;;  %402 = vmatpush3.bf16.msra.mxu1 %v447_v5  ;;  %v451_v9 = vld [vmem:[#allocation2 + $0x20] sm:$0xff]   ;;  %v453_v11 = vld [vmem:[#allocation2 + $0x30] sm:$0xff]   ;;  %v454_v12 = vld [vmem:[#allocation2 + $0x38] sm:$0xff]  }
  0x29   :  { %421 = vmatprep.subr.bf16.mxu0 %v515_v0  ;;  %403 = vmatprep.subr.bf16.mxu1 %v515_v0  ;;  %v455_v13 = vld [vmem:[#allocation4] sm:$0xff]   ;;  %v456_v14 = vld [vmem:[#allocation4 + $0x8] sm:$0xff]   ;;  %v457_v15 = vld [vmem:[#allocation4 + $0x10] sm:$0xff]   ;;  %vm343_vm3 = vcmp.ge.s32.totalorder %v342_v42, 1 }
  0x2a   :  { %v458_v16 = vld [vmem:[#allocation4 + $0x18] sm:$0xff]   ;;  %v459_v17 = vld [vmem:[#allocation4 + $0x20] sm:$0xff]   ;;  %v460_v18 = vld [vmem:[#allocation4 + $0x28] sm:$0xff]  }
  0x2b   :  { %398 = vmatmul.mubr.msk.bf16.vlgmr.msra.gmra.mrb[0].mxu0 %vm65_vm2, %v56_v4  ;;  %v355_v19 = vld [vmem:[%s624_s2] ss:$0 sm:$0xff]  ;;  %v461_v28 = vld [vmem:[#allocation4 + $0x30] sm:$0xff]   ;;  %v462_v29 = vld [vmem:[#allocation4 + $0x38] sm:$0xff]  }
  0x2c   :  { %437 = vmatprep.mubr.msk.bf16.mxu0 %vm516_vm0, %v515_v0  ;;  %404 = vmatpush3.bf16.msra.mxu1 %v448_v6  ;;  %v357_v30 = vld [vmem:[%s626_s4] ss:$0 sm:$0xff] }
  0x2d   :  { %405 = vmatprep.subr.bf16.mxu1 %v515_v0  ;;  %422 = vmatpush3.bf16.msra.mxu0 %v455_v13  ;;  %v366_v40 = vld [vmem:[%s628_s6] ss:$0 sm:$0xff] }
  0x2e   :  { %423 = vmatprep.subr.bf16.mxu0 %v515_v0 }
  0x30   :  { %406 = vmatpush3.bf16.msra.mxu1 %v449_v7 }
  0x31   :  { %407 = vmatprep.subr.bf16.mxu1 %v515_v0  ;;  %424 = vmatpush3.bf16.msra.mxu0 %v456_v14 }
  0x32   :  { %425 = vmatprep.subr.bf16.mxu0 %v515_v0 }
  0x34   :  { %408 = vmatpush3.bf16.msra.mxu1 %v450_v8 }
  0x35   :  { %409 = vmatprep.subr.bf16.mxu1 %v515_v0  ;;  %426 = vmatpush3.bf16.msra.mxu0 %v457_v15 }
  0x36   :  { %427 = vmatprep.subr.bf16.mxu0 %v515_v0 }
  0x38   :  { %410 = vmatpush3.bf16.msra.mxu1 %v451_v9 }
  0x39   :  { %411 = vmatprep.subr.bf16.mxu1 %v515_v0  ;;  %428 = vmatpush3.bf16.msra.mxu0 %v458_v16 }
  0x3a   :  { %429 = vmatprep.subr.bf16.mxu0 %v515_v0 }
  0x3c   :  { %412 = vmatpush3.bf16.msra.mxu1 %v452_v10 }
  0x3d   :  { %413 = vmatprep.subr.bf16.mxu1 %v515_v0  ;;  %430 = vmatpush3.bf16.msra.mxu0 %v459_v17 }
  0x3e   :  { %431 = vmatprep.subr.bf16.mxu0 %v515_v0 }
  0x40   :  { %414 = vmatpush3.bf16.msra.mxu1 %v453_v11 }
  0x41   :  { %415 = vmatprep.subr.bf16.mxu1 %v515_v0  ;;  %432 = vmatpush3.bf16.msra.mxu0 %v460_v18 }
  0x42   :  { %433 = vmatprep.subr.bf16.mxu0 %v515_v0 }
  0x44   :  { %416 = vmatpush3.bf16.msra.mxu1 %v454_v12 }
  0x45   :  { %434 = vmatpush3.bf16.msra.mxu0 %v461_v28 }
  0x46   :  { %435 = vmatprep.subr.bf16.mxu0 %v515_v0 }
  0x49   :  { %436 = vmatpush3.bf16.msra.mxu0 %v462_v29 }
  0xfe   :  { %v107_v20 = vpop.f32.mrb[0].mxu0 }
  0xff   :  { %v108_v21 = vadd.f32 %v355_v19, %v107_v20  ;;  %v399_v22 = vpop.f32.mrb[1].mxu0 }
 0x100   :  { %v110_v23 = vpop.f32.mrb[2].mxu0 }
 0x101   :  { %v113_v24 = vmul.f32 0.01, %v108_v21  ;;  %v400_v25 = vpop.f32.mrb[3].mxu0 }
 0x103   :  { %v114_v26 = vmax.f32 %v108_v21, %v113_v24 }
 0x105   :  { %v115_v27 = vpack.c.bf16 %v114_v26, %v114_v26 }
 0x107   :  { %418 = vmatmul.mubr.bf16.vlgmr.msra.gmra.mrb[0].mxu1 %v115_v27 }
 0x1da   :  { %v221_v31 = vpop.f32.mrb[0].mxu1 }
 0x1db   :  { %v222_v32 = vadd.f32 %v357_v30, %v221_v31  ;;  %v419_v33 = vpop.f32.mrb[1].mxu1 }
 0x1dc   :  { %v224_v34 = vpop.f32.mrb[2].mxu1 }
 0x1dd   :  { %v227_v35 = vmul.f32 0.01, %v222_v32  ;;  %v420_v36 = vpop.f32.mrb[3].mxu1 }
 0x1df   :  { %v228_v37 = vmax.f32 %v222_v32, %v227_v35 }
 0x1e1   :  { %v229_v38 = vpack.c.bf16 %v228_v37, %v228_v37 }
 0x1e3   :  { %438 = vmatmul.mubr.bf16.vlgmr.msra.gmra.mrb[4].mxu0 %v229_v38 }
 0x2b6   :  { %v335_v41 = vpop.f32.mrb[4].mxu0 }
 0x2b7   :  { %v336_v43 = vadd.f32 %v366_v40, %v335_v41  ;;  %v439_v44 = vpop.f32.mrb[5].mxu0 }
 0x2b8   :  { %v338_v45 = vpop.f32.mrb[6].mxu0 }
 0x2b9   :  { %v344_v46 = vmax.f32 %v336_v43, -20.0  ;;  %v440_v47 = vpop.f32.mrb[7].mxu0 }
 0x2bb   :  { %v345_v48 = vmin.f32 %v344_v46, 2.0 }
 0x2bd   :  { %v346_v49 = vsel %vm343_vm3, %v345_v48, %v336_v43 }
 0x2be   :  { %348 = vst.msk [vmem:[%s629_s7] sm:$0xff] %vm347_vm4, %v346_v49 }
 0x2bf   :  { %353 = vsyncpa [#allocation3], 1 }
 0x2c0   :  { %354 = vsyncpa [#allocation5], 1 }

</bundles_post_ra>
